<compile_context>
chip_gen: v7x
topology: tpu7x:2x2x1
jax: 0.10.0
libtpu: 0.0.40
codegen_flags: <defaults>
</compile_context>

<pallas_src>
import functools
import math

import jax
import jax.numpy as jnp
from jax.experimental import pallas as pl
from jax.experimental.pallas import tpu as pltpu


_LANE = 128
_SUBLANE = 8
_VMEM_BUDGET = 40 * 1024 * 1024      # conservative: fits under v7x's 64 MiB physical VMEM
_VMEM_LIMIT_CAP = 48 * 1024 * 1024   # never request more scoped VMEM than this


def _round_up(x: int, m: int) -> int:
    return ((x + m - 1) // m) * m


def _cdiv(a: int, b: int) -> int:
    return -(-a // b)


def _choose_pack_factor(two_e: int, vocab_sum: int, tbl_itemsize: int) -> int:
    """Tokens packed per output row so stores are lane-dense (row width % 128 == 0)."""
    p0 = 1 if two_e % _LANE == 0 else _LANE // math.gcd(two_e, _LANE)

    def table_bytes(p):
        return p * vocab_sum * _round_up(p * two_e, _LANE) * tbl_itemsize

    p = p0
    # Optionally double P so the packed row is a multiple of 256 lanes (fills the 256-wide
    # MXU on v6e/v7x, 2-vreg stores) while the fused table stays tiny.
    if (p0 * two_e) % 256 != 0 and table_bytes(2 * p0) <= (2 << 20) and 2 * p0 * vocab_sum <= 2048:
        p = 2 * p0
    # If the lane-dense table would not fit comfortably in VMEM, step back down; as a last
    # resort fall back to P=1 (narrow masked stores: correct, just slower) rather than OOM.
    if table_bytes(p) > _VMEM_BUDGET // 2:
        p = p0
    if table_bytes(p) > _VMEM_BUDGET // 2:
        p = 1
    return p


def _build_fused_table(token_table, diac_table, pack):
    """Block-diagonal [[tok, 0], [0, diac]] table, replicated `pack` times on the diagonal."""
    vt, e = token_table.shape
    vd, _ = diac_table.shape
    base = jnp.zeros((vt + vd, 2 * e), dtype=token_table.dtype)
    base = base.at[:vt, :e].set(token_table)
    base = base.at[vt:, e:].set(diac_table)
    if pack == 1:
        return base
    return jnp.kron(jnp.eye(pack, dtype=token_table.dtype), base)


def _concat_embed_kernel(ids_ref, table_ref, out_ref):
    # ids_ref:   (tile_rows, 2*P) int32 — indices pre-offset into the fused vocab axis.
    # table_ref: (K, P*2E)            — block-diagonal fused table, whole array in VMEM.
    # out_ref:   (tile_rows, P*2E)
    n_sel = ids_ref.shape[1]
    k = table_ref.shape[0]

    ids = ids_ref[...]
    # (1, K) iota; broadcasting in the compares avoids a (tile_rows, K) int32 temporary.
    iota = jax.lax.broadcasted_iota(jnp.int32, (1, k), 1)

    # Multi-hot selection matrix: the 2*P selected table rows per packed row are disjoint.
    # TODO(synk): per-slot restricted compares (Vt/Vd-wide segments) once K reaches thousands.
    hit = ids[:, 0:1] == iota
    for c in range(1, n_sel):
        hit = jnp.logical_or(hit, ids[:, c:c + 1] == iota)
    sel = hit.astype(table_ref.dtype)

    # One MXU matmul: the block-diagonal table routes every lookup into its own output
    # column block, so the result lands already in the concatenated layout.
    out_ref[...] = jnp.dot(
        sel, table_ref[...], preferred_element_type=jnp.float32
    ).astype(out_ref.dtype)


def _plan_tiles(rows_needed, *, row_w, k, two_p, out_itemsize, table_bytes, tile_rows_cap):
    """Pick tile height, grid steps, padded rows and an explicit scoped-VMEM limit."""
    k_pad = _round_up(k, _LANE)
    # Per-row VMEM that scales with the tile: ids (2 bufs, lane padded) + out (2 bufs)
    # + in-kernel intermediates (hit/sel over padded K, f32 matmul result before cast).
    per_row = (2 * _round_up(two_p, _LANE) * 4
               + 2 * row_w * out_itemsize
               + 4 * k_pad * 4
               + row_w * 4)
    avail = max(_VMEM_BUDGET - table_bytes, per_row * _SUBLANE)
    tr_cap = max(_SUBLANE, (avail // per_row) // _SUBLANE * _SUBLANE)
    tr_cap = min(tr_cap, _round_up(max(tile_rows_cap, _SUBLANE), _SUBLANE))

    # >= 2 grid steps once there is real work, so both v7x TensorCores get a share.
    min_steps = 2 if rows_needed >= 2 * _SUBLANE else 1
    steps = max(min_steps, _cdiv(rows_needed, tr_cap))
    # tr (nearly) evenly divides the work -> padding waste <= one sublane-tile per step,
    # instead of up to an entire tile of extra output DMA.
    tr = min(_round_up(_cdiv(rows_needed, steps), _SUBLANE), tr_cap)
    steps = _cdiv(rows_needed, tr)
    rows_pad = steps * tr

    est = table_bytes + tr * per_row
    vmem_limit = int(min(max(est + est // 2 + (4 << 20), 32 << 20), _VMEM_LIMIT_CAP))
    return tr, steps, rows_pad, vmem_limit


@functools.partial(
    jax.jit,
    static_argnames=("token_vocab", "diac_vocab", "pack", "tile_rows_cap", "out_dtype"))
def _concat_embedding_call(token_inputs, diac_inputs, fused_table, *,
                           token_vocab, diac_vocab, pack, tile_rows_cap, out_dtype):
    B, S = token_inputs.shape
    K, row_w = fused_table.shape
    P = pack
    two_e = row_w // P
    n = B * S
    rows_needed = _cdiv(n, P)

    table_bytes = _round_up(K, _SUBLANE) * row_w * jnp.dtype(fused_table.dtype).itemsize
    tr, steps, rows_pad, vmem_limit = _plan_tiles(
        rows_needed, row_w=row_w, k=K, two_p=2 * P,
        out_itemsize=jnp.dtype(out_dtype).itemsize,
        table_bytes=table_bytes, tile_rows_cap=tile_rows_cap)

    # Flatten, pad (jnp.pad, no scatter), pre-offset indices into the fused vocab axis.
    pad_tok = rows_pad * P - n
    tok_flat = token_inputs.reshape(-1).astype(jnp.int32)
    diac_flat = diac_inputs.reshape(-1).astype(jnp.int32)
    if pad_tok:
        tok_flat = jnp.pad(tok_flat, (0, pad_tok))
        diac_flat = jnp.pad(diac_flat, (0, pad_tok))
    slot_off = jnp.arange(P, dtype=jnp.int32) * (token_vocab + diac_vocab)
    tok_ids = tok_flat.reshape(rows_pad, P) + slot_off
    diac_ids = diac_flat.reshape(rows_pad, P) + slot_off + token_vocab
    ids = jnp.stack([tok_ids, diac_ids], axis=-1).reshape(rows_pad, 2 * P)

    out_packed = pl.pallas_call(
        _concat_embed_kernel,
        out_shape=jax.ShapeDtypeStruct((rows_pad, row_w), out_dtype),
        grid_spec=pltpu.PrefetchScalarGridSpec(
            num_scalar_prefetch=0,
            grid=(steps,),
            in_specs=[
                pl.BlockSpec((tr, 2 * P), lambda i: (i, 0)),     # packed, pre-offset indices
                # Fused table: whole array resident in VMEM (single buffer, no per-step DMA).
                pl.BlockSpec(memory_space=pltpu.MemorySpace.VMEM),
            ],
            out_specs=pl.BlockSpec((tr, row_w), lambda i: (i, 0)),
        ),
        compiler_params=pltpu.CompilerParams(
            dimension_semantics=("parallel",),
            vmem_limit_bytes=vmem_limit,
        ),
    )(ids, fused_table)

    out_flat = out_packed.reshape(rows_pad * P, two_e)
    if rows_pad * P != n:
        out_flat = out_flat[:n]
    return out_flat.reshape(B, S, two_e)


class ConcatinateEmbedding:
    """JAX/Pallas port of the PyTorch ConcatinateEmbedding forward pass.

    The fused block-diagonal lookup table is a pure function of the parameters and is built
    once here (hoisted out of the per-call jit), mirroring the nn.Module owning its weights.
    """

    def __init__(self, token_table, diac_table, *, out_dtype=None, tile_rows=2048):
        token_table = jnp.asarray(token_table)
        diac_table = jnp.asarray(diac_table)
        assert token_table.shape[1] == diac_table.shape[1], "embedding sizes must match"
        self.token_vocab, self.embedding_size = token_table.shape
        self.diac_vocab = diac_table.shape[0]
        self.out_dtype = jnp.dtype(out_dtype) if out_dtype is not None else token_table.dtype
        self.tile_rows = int(tile_rows)

        two_e = 2 * self.embedding_size
        vocab_sum = self.token_vocab + self.diac_vocab
        tbl_itemsize = jnp.dtype(token_table.dtype).itemsize
        self.pack = _choose_pack_factor(two_e, vocab_sum, tbl_itemsize)

        if vocab_sum * _round_up(two_e, _LANE) * tbl_itemsize > _VMEM_BUDGET // 2:
            # TODO(synk): large-vocab escape hatch — scalar-prefetch / manual DMA row gather
            # from an HBM-resident table instead of the VMEM-resident one-hot matmul.
            raise NotImplementedError(
                "Embedding tables too large for the VMEM one-hot-matmul path.")

        self.fused_table = _build_fused_table(token_table, diac_table, self.pack)

    def __call__(self, token_inputs, diac_inputs):
        return _concat_embedding_call(
            token_inputs, diac_inputs, self.fused_table,
            token_vocab=self.token_vocab, diac_vocab=self.diac_vocab,
            pack=self.pack, tile_rows_cap=self.tile_rows, out_dtype=self.out_dtype)


def concat_embedding(token_inputs, diac_inputs, token_table, diac_table,
                     *, out_dtype=None, tile_rows=2048):
    """Functional convenience wrapper (builds the fused table per call)."""
    mod = ConcatinateEmbedding(token_table, diac_table, out_dtype=out_dtype,
                               tile_rows=tile_rows)
    return mod(token_inputs, diac_inputs)


if __name__ == "__main__":
    # Small synthetic config consistent with the module's forward.
    token_vocab_size = 40
    diac_vocab_size = 12
    embedding_size = 32
    batch, seq = 2, 8

    key = jax.random.PRNGKey(0)
    k_tok_tab, k_diac_tab, k_tok_in, k_diac_in = jax.random.split(key, 4)

    # nn.Embedding default init: N(0, 1).
    token_table = jax.random.normal(k_tok_tab, (token_vocab_size, embedding_size), jnp.float32)
    diac_table = jax.random.normal(k_diac_tab, (diac_vocab_size, embedding_size), jnp.float32)

    token_inputs = jax.random.randint(k_tok_in, (batch, seq), 0, token_vocab_size, jnp.int32)
    diac_inputs = jax.random.randint(k_diac_in, (batch, seq), 0, diac_vocab_size, jnp.int32)

    module = ConcatinateEmbedding(token_table, diac_table)
    out = module(token_inputs, diac_inputs)
    out = jax.block_until_ready(out)

    # Reference check against plain JAX gather + concat.
    ref = jnp.concatenate(
        [token_table[token_inputs], diac_table[diac_inputs]], axis=-1)
    assert out.shape == (batch, seq, 2 * embedding_size), out.shape
    assert out.dtype == token_table.dtype, out.dtype
    assert jnp.allclose(out, ref, atol=1e-6), "mismatch vs reference"

    print("KERNEL_OK")
</pallas_src>

<mosaic_0001>
module attributes {stable_mosaic.version = 11 : i64} {
  func.func @_concat_embed_kernel(%arg0: i32, %arg1: memref<8x8xi32, #tpu.memory_space<vmem>>, %arg2: memref<208x256xf32, #tpu.memory_space<vmem>>, %arg3: memref<8x256xf32, #tpu.memory_space<vmem>>) attributes {dimension_semantics = [#tpu.dimension_semantics<parallel>], iteration_bounds = array<i64: 1>, scalar_prefetch = 0 : i64, scratch_operands = 0 : i64, tpu.core_type = #tpu.core_type<tc>, window_params = [{transform_indices = @transform_0, window_bounds = array<i64: 8, 8>}, {pipeline_mode = #tpu.pipeline_mode<synchronous>, transform_indices = @transform_1, window_bounds = array<i64: 208, 256>}, {transform_indices = @transform_2, window_bounds = array<i64: 8, 256>}]} {
    %c0 = arith.constant 0 : index
    %c0_0 = arith.constant 0 : index
    %0 = vector.load %arg1[%c0, %c0_0] : memref<8x8xi32, #tpu.memory_space<vmem>>, vector<8x8xi32>
    %1 = tpu.iota {dimensions = array<i32: 1>} : vector<1x208xi32>
    %2 = vector.extract_strided_slice %0 {offsets = [0, 0], sizes = [8, 1], strides = [1, 1]} : vector<8x8xi32> to vector<8x1xi32>
    %3 = vector.broadcast %2 : vector<8x1xi32> to vector<8x208xi32>
    %4 = vector.broadcast %1 : vector<1x208xi32> to vector<8x208xi32>
    %5 = arith.cmpi eq, %3, %4 : vector<8x208xi32>
    %6 = vector.extract_strided_slice %0 {offsets = [0, 1], sizes = [8, 1], strides = [1, 1]} : vector<8x8xi32> to vector<8x1xi32>
    %7 = vector.broadcast %6 : vector<8x1xi32> to vector<8x208xi32>
    %8 = vector.broadcast %1 : vector<1x208xi32> to vector<8x208xi32>
    %9 = arith.cmpi eq, %7, %8 : vector<8x208xi32>
    %10 = arith.ori %5, %9 : vector<8x208xi1>
    %11 = vector.extract_strided_slice %0 {offsets = [0, 2], sizes = [8, 1], strides = [1, 1]} : vector<8x8xi32> to vector<8x1xi32>
    %12 = vector.broadcast %11 : vector<8x1xi32> to vector<8x208xi32>
    %13 = vector.broadcast %1 : vector<1x208xi32> to vector<8x208xi32>
    %14 = arith.cmpi eq, %12, %13 : vector<8x208xi32>
    %15 = arith.ori %10, %14 : vector<8x208xi1>
    %16 = vector.extract_strided_slice %0 {offsets = [0, 3], sizes = [8, 1], strides = [1, 1]} : vector<8x8xi32> to vector<8x1xi32>
    %17 = vector.broadcast %16 : vector<8x1xi32> to vector<8x208xi32>
    %18 = vector.broadcast %1 : vector<1x208xi32> to vector<8x208xi32>
    %19 = arith.cmpi eq, %17, %18 : vector<8x208xi32>
    %20 = arith.ori %15, %19 : vector<8x208xi1>
    %21 = vector.extract_strided_slice %0 {offsets = [0, 4], sizes = [8, 1], strides = [1, 1]} : vector<8x8xi32> to vector<8x1xi32>
    %22 = vector.broadcast %21 : vector<8x1xi32> to vector<8x208xi32>
    %23 = vector.broadcast %1 : vector<1x208xi32> to vector<8x208xi32>
    %24 = arith.cmpi eq, %22, %23 : vector<8x208xi32>
    %25 = arith.ori %20, %24 : vector<8x208xi1>
    %26 = vector.extract_strided_slice %0 {offsets = [0, 5], sizes = [8, 1], strides = [1, 1]} : vector<8x8xi32> to vector<8x1xi32>
    %27 = vector.broadcast %26 : vector<8x1xi32> to vector<8x208xi32>
    %28 = vector.broadcast %1 : vector<1x208xi32> to vector<8x208xi32>
    %29 = arith.cmpi eq, %27, %28 : vector<8x208xi32>
    %30 = arith.ori %25, %29 : vector<8x208xi1>
    %31 = vector.extract_strided_slice %0 {offsets = [0, 6], sizes = [8, 1], strides = [1, 1]} : vector<8x8xi32> to vector<8x1xi32>
    %32 = vector.broadcast %31 : vector<8x1xi32> to vector<8x208xi32>
    %33 = vector.broadcast %1 : vector<1x208xi32> to vector<8x208xi32>
    %34 = arith.cmpi eq, %32, %33 : vector<8x208xi32>
    %35 = arith.ori %30, %34 : vector<8x208xi1>
    %36 = vector.extract_strided_slice %0 {offsets = [0, 7], sizes = [8, 1], strides = [1, 1]} : vector<8x8xi32> to vector<8x1xi32>
    %37 = vector.broadcast %36 : vector<8x1xi32> to vector<8x208xi32>
    %38 = vector.broadcast %1 : vector<1x208xi32> to vector<8x208xi32>
    %39 = arith.cmpi eq, %37, %38 : vector<8x208xi32>
    %40 = arith.ori %35, %39 : vector<8x208xi1>
    %41 = arith.extui %40 : vector<8x208xi1> to vector<8x208xi32>
    %42 = arith.sitofp %41 : vector<8x208xi32> to vector<8x208xf32>
    %c0_1 = arith.constant 0 : index
    %c0_2 = arith.constant 0 : index
    %43 = vector.load %arg2[%c0_1, %c0_2] : memref<208x256xf32, #tpu.memory_space<vmem>>, vector<208x256xf32>
    %cst = arith.constant dense<0.000000e+00> : vector<8x256xf32>
    %44 = tpu.matmul %42, %43, %cst {dimension_numbers = #tpu.dot_dimension_numbers<[1], [0], [0], [1], [0, 0, 1, 1], [], []>} : vector<8x208xf32>, vector<208x256xf32>, vector<8x256xf32> -> vector<8x256xf32>
    %c0_3 = arith.constant 0 : index
    %c0_4 = arith.constant 0 : index
    %45 = vector.load %arg3[%c0_3, %c0_4] : memref<8x256xf32, #tpu.memory_space<vmem>>, vector<8x256xf32>
    tpu.vector_store %arg3[%c0_3, %c0_4], %44 {strides = array<i32>} : memref<8x256xf32, #tpu.memory_space<vmem>>, vector<8x256xf32>,
    return
  }
  func.func @transform_0(%arg0: i32) -> (i32, i32) {
    %c0_i32 = arith.constant 0 : i32
    %c0_i32_0 = arith.constant 0 : i32
    return %arg0, %c0_i32 : i32, i32
  }
  func.func @transform_1(%arg0: i32) -> (i32, i32) {
    %c0_i32 = arith.constant 0 : i32
    %c0_i32_0 = arith.constant 0 : i32
    %c0_i32_1 = arith.constant 0 : i32
    return %c0_i32, %c0_i32_0 : i32, i32
  }
  func.func @transform_2(%arg0: i32) -> (i32, i32) {
    %c0_i32 = arith.constant 0 : i32
    %c0_i32_0 = arith.constant 0 : i32
    return %arg0, %c0_i32 : i32, i32
  }
}

</mosaic_0001>

<bundles_post_ra>
// kernel: _concat_embedding_call.1
= control target key start
LH: loop header
LB: loop body
LE: loop exit
PB: predicated region body
PF: predicated region fallthrough
CT: control target
= control target key end

     0   :  { %7 = vsyncpa [#allocation3], 0  ;;  %s321_s9 = smov [#allocation2]   ;;  %s379_s0 = inlined_call_operand.vmem [shape: s32[8,8], index: 0, kind: input, shape index: {}]   ;;  %s380_s1 = inlined_call_operand.hbm [shape: f32[208,256], index: 1, kind: input, shape index: {}]   ;;  %s381_s2 = inlined_call_operand.vmem [shape: f32[8,256], index: 2, kind: output, shape index: {}]  }
   0x1   :  { %s15_s10 = sshll.u32 %s321_s9, 4  ;;  %s297_s13 = scalar_lea.hbm %s380_s1, 6656  ;;  %s16_s10 = int_to_ptr.vmem [resolvable:$true] %s15_s10 }
   0x2   :  { %p298_p0 = scmp.ne.s32.totalorder %s380_s1, %s297_s13  ;;  %p301_p1 = scmp.lt.u32.totalorder %s297_s13, %s380_s1 }
   0x4   :  { %p303_p2 = pnand %p301_p1, %p298_p0 }
   0x6   :  { %306 = shalt.err (!%p303_p2)
}
   0x7   :  { %s307_s18 = scalar_lea.vmem %s16_s10, 6656  ;;  %p312_p4 = scmp.lt.s32.totalorder %s16_s10, %s16_s10 }
   0x8   :  { %p308_p3 = scmp.ne.s32.totalorder %s16_s10, %s307_s18  ;;  %p313_p5 = scmp.lt.s32.totalorder %s307_s18, %s307_s18 }
   0xa   :  { %p314_p6 = por %p313_p5, %p312_p4 }
   0xc   :  { %p315_p7 = pnand %p314_p6, %p308_p3 }
   0xe   :  { %318 = shalt.err (!%p315_p7)
}
   0xf   :  { %s322_s19 = smov 256   ;;  %s323_s20 = smov 16  }
  0x10   :  { %21 = dma.hbm_to_vmem [thread:$0]  %s380_s1, 6656, %s16_s10, [#allocation3], %s322_s19, %s322_s19, %s323_s20  }
  0x11   :  { %319 = dma.done.wait [#allocation3], 6656  }
  0x12   :  { %320 = vsyncadd [#allocation3], 4294960640  ;;  %v324_v0 = vmov 2   ;;  %v325_v1 = vmov 0   ;;  %v363_v2 = vld [vmem:[%s379_s0] sm:$0xff]  ;;  %v88_v3 = vld [vmem:[#allocation2 + $0x8] sm:$0xff] }
  0x13   :  { %290 = vset.pattern.permute.xlu1 %v324_v0  ;;  %288 = vset.pattern.permute.xlu0 %v325_v1  ;;  %v90_v4 = vld [vmem:[#allocation2 + $0x18] sm:$0xff]  ;;  %v87_v6 = vld [vmem:[#allocation2] sm:$0xff]  ;;  %v89_v7 = vld [vmem:[#allocation2 + $0x10] sm:$0xff]  ;;  %v326_v17 = vmov 3   ;;  %v327_v18 = vmov 1   ;;  %v328_v28 = vmov 4  }
  0x14   :  { %42 = vperm.xlu1 %290, %v363_v2   ;;  %30 = vperm.xlu0 %288, %v363_v2   ;;  %v224_v5 = vpack.c.bf16 %v90_v4, %v88_v3  ;;  %v92_v8 = vld [vmem:[#allocation2 + $0x28] sm:$0xff]  ;;  %v226_v9 = vpack.c.bf16 %v89_v7, %v87_v6  ;;  %v94_v10 = vld [vmem:[#allocation2 + $0x38] sm:$0xff]  ;;  %v91_v11 = vld [vmem:[#allocation2 + $0x20] sm:$0xff]  ;;  %v329_v29 = vmov 5   ;;  %v330_v38 = vmov 6  }
  0x15   :  { %v93_v12 = vld [vmem:[#allocation2 + $0x30] sm:$0xff]  ;;  %v228_v13 = vpack.c.bf16 %v94_v10, %v92_v8  ;;  %v96_v14 = vld [vmem:[#allocation2 + $0x48] sm:$0xff]  ;;  %v98_v15 = vld [vmem:[#allocation2 + $0x58] sm:$0xff]  ;;  %v331_v39 = vmov 7  }
  0x16   :  { %225 = vmatprep.subr.bf16.mxu0 %v224_v5  ;;  %v230_v16 = vpack.c.bf16 %v93_v12, %v91_v11  ;;  %v232_v19 = vpack.c.bf16 %v98_v15, %v96_v14  ;;  %v95_v20 = vld [vmem:[#allocation2 + $0x40] sm:$0xff]  ;;  %v97_v21 = vld [vmem:[#allocation2 + $0x50] sm:$0xff]  ;;  %v100_v22 = vld [vmem:[#allocation2 + $0x68] sm:$0xff] }
  0x17   :  { %227 = vmatpush1.bf16.msra.mxu0 %v226_v9  ;;  %v102_v23 = vld [vmem:[#allocation2 + $0x78] sm:$0xff]  ;;  %v234_v24 = vpack.c.bf16 %v97_v21, %v95_v20  ;;  %v99_v26 = vld [vmem:[#allocation2 + $0x60] sm:$0xff]  ;;  %v101_v27 = vld [vmem:[#allocation2 + $0x70] sm:$0xff] }
  0x18   :  { %291 = vset.pattern.permute.xlu1 %v326_v17  ;;  %289 = vset.pattern.permute.xlu0 %v327_v18  ;;  %v236_v25 = vpack.c.bf16 %v102_v23, %v100_v22  ;;  %v104_v30 = vld [vmem:[#allocation2 + $0x88] sm:$0xff]  ;;  %v106_v31 = vld [vmem:[#allocation2 + $0x98] sm:$0xff]  ;;  %v238_v32 = vpack.c.bf16 %v101_v27, %v99_v26  ;;  %v103_v34 = vld [vmem:[#allocation2 + $0x80] sm:$0xff]  ;;  %v26_v23 = vlaneseq }
  0x19   :  { %49 = vperm.xlu1 %291, %v363_v2   ;;  %35 = vperm.xlu0 %289, %v363_v2   ;;  %v240_v33 = vpack.c.bf16 %v106_v31, %v104_v30  ;;  %v105_v35 = vld [vmem:[#allocation2 + $0x90] sm:$0xff]  ;;  %v108_v36 = vld [vmem:[#allocation2 + $0xa8] sm:$0xff]  ;;  %v110_v37 = vld [vmem:[#allocation2 + $0xb8] sm:$0xff] }
  0x1a   :  { %229 = vmatprep.subr.bf16.mxu0 %v228_v13  ;;  %v242_v40 = vpack.c.bf16 %v105_v35, %v103_v34  ;;  %v244_v41 = vpack.c.bf16 %v110_v37, %v108_v36  ;;  %v107_v42 = vld [vmem:[#allocation2 + $0xa0] sm:$0xff]  ;;  %v109_v43 = vld [vmem:[#allocation2 + $0xb0] sm:$0xff]  ;;  %v112_v44 = vld [vmem:[#allocation2 + $0xc8] sm:$0xff]  ;;  %v332_v34 = vmov 0.0  }
  0x1b   :  { %231 = vmatpush1.bf16.msra.mxu0 %v230_v16  ;;  %v114_v45 = vld [vmem:[#allocation2 + $0xd8] sm:$0xff]  ;;  %v246_v46 = vpack.c.bf16 %v109_v43, %v107_v42  ;;  %v111_v48 = vld [vmem:[#allocation2 + $0xc0] sm:$0xff]  ;;  %v113_v49 = vld [vmem:[#allocation2 + $0xd0] sm:$0xff] }
  0x1c   :  { %233 = vmatprep.subr.bf16.mxu0 %v232_v19  ;;  %v248_v47 = vpack.c.bf16 %v114_v45, %v112_v44  ;;  %v116_v50 = vld [vmem:[#allocation2 + $0xe8] sm:$0xff]  ;;  %v118_v51 = vld [vmem:[#allocation2 + $0xf8] sm:$0xff]  ;;  %v250_v52 = vpack.c.bf16 %v113_v49, %v111_v48  ;;  %v115_v54 = vld [vmem:[#allocation2 + $0xe0] sm:$0xff] }
  0x1d   :  { %292 = vset.pattern.permute.xlu1 %v328_v28  ;;  %293 = vset.pattern.permute.xlu0 %v329_v29  ;;  %v252_v53 = vpack.c.bf16 %v118_v51, %v116_v50  ;;  %v117_v55 = vld [vmem:[#allocation2 + $0xf0] sm:$0xff]  ;;  %v120_v56 = vld [vmem:[#allocation2 + $0x108] sm:$0xff]  ;;  %v122_v57 = vld [vmem:[#allocation2 + $0x118] sm:$0xff] }
  0x1e   :  { %56 = vperm.xlu1 %292, %v363_v2   ;;  %63 = vperm.xlu0 %293, %v363_v2   ;;  %v254_v58 = vpack.c.bf16 %v117_v55, %v115_v54  ;;  %v256_v59 = vpack.c.bf16 %v122_v57, %v120_v56  ;;  %v119_v60 = vld [vmem:[#allocation2 + $0x100] sm:$0xff]  ;;  %v121_v61 = vld [vmem:[#allocation2 + $0x110] sm:$0xff]  ;;  %v124_v62 = vld [vmem:[#allocation2 + $0x128] sm:$0xff] }
  0x1f   :  { %235 = vmatpush1.bf16.msra.mxu0 %v234_v24  ;;  %v126_v63 = vld [vmem:[#allocation2 + $0x138] sm:$0xff]  ;;  %v258_v0 = vpack.c.bf16 %v121_v61, %v119_v60  ;;  %v125_v3 = vld [vmem:[#allocation2 + $0x130] sm:$0xff]  ;;  %v128_v4 = vld [vmem:[#allocation2 + $0x148] sm:$0xff]  ;;  %v27_v24 = vand.u32 127, %v26_v23 }
  0x20   :  { %237 = vmatprep.subr.bf16.mxu0 %v236_v25  ;;  %v260_v1 = vpack.c.bf16 %v126_v63, %v124_v62  ;;  %v130_v5 = vld [vmem:[#allocation2 + $0x158] sm:$0xff]  ;;  %v127_v8 = vld [vmem:[#allocation2 + $0x140] sm:$0xff]  ;;  %v129_v9 = vld [vmem:[#allocation2 + $0x150] sm:$0xff] }
  0x21   :  { %v264_v7 = vpack.c.bf16 %v130_v5, %v128_v4  ;;  %v132_v10 = vld [vmem:[#allocation2 + $0x168] sm:$0xff]  ;;  %v134_v11 = vld [vmem:[#allocation2 + $0x178] sm:$0xff]  ;;  %v266_v12 = vpack.c.bf16 %v129_v9, %v127_v8  ;;  %v131_v14 = vld [vmem:[#allocation2 + $0x160] sm:$0xff]  ;;  %v28_v27 = vadd.s32 128, %v27_v24 }
  0x22   :  { %294 = vset.pattern.permute.xlu1 %v330_v38  ;;  %296 = vset.pattern.permute.xlu0 %v331_v39  ;;  %v268_v13 = vpack.c.bf16 %v134_v11, %v132_v10  ;;  %v133_v15 = vld [vmem:[#allocation2 + $0x170] sm:$0xff]  ;;  %v136_v16 = vld [vmem:[#allocation2 + $0x188] sm:$0xff]  ;;  %v138_v17 = vld [vmem:[#allocation2 + $0x198] sm:$0xff] }
  0x23   :  { %70 = vperm.xlu1 %294, %v363_v2   ;;  %239 = vmatpush1.bf16.msra.mxu0 %v238_v32  ;;  %v270_v18 = vpack.c.bf16 %v133_v15, %v131_v14  ;;  %v272_v19 = vpack.c.bf16 %v138_v17, %v136_v16  ;;  %v135_v20 = vld [vmem:[#allocation2 + $0x180] sm:$0xff]  ;;  %v137_v21 = vld [vmem:[#allocation2 + $0x190] sm:$0xff] }
  0x24   :  { %241 = vmatprep.subr.bf16.mxu0 %v240_v33  ;;  %v274_v22 = vpack.c.bf16 %v137_v21, %v135_v20 }
  0x27   :  { %295 = vset.pattern.permute.xlu1 %v331_v39  ;;  %243 = vmatpush1.bf16.msra.mxu0 %v242_v40 }
  0x28   :  { %77 = vperm.xlu1 %295, %v363_v2   ;;  %245 = vmatprep.subr.bf16.mxu0 %v244_v41  ;;  %v123_v2 = vld [vmem:[#allocation2 + $0x120] sm:$0xff] }
  0x29   :  { %v262_v6 = vpack.c.bf16 %v125_v3, %v123_v2 }
  0x2b   :  { %247 = vmatpush1.bf16.msra.mxu0 %v246_v46 }
  0x2c   :  { %249 = vmatprep.subr.bf16.mxu0 %v248_v47 }
  0x2f   :  { %251 = vmatpush1.bf16.msra.mxu0 %v250_v52 }
  0x30   :  { %253 = vmatprep.subr.bf16.mxu0 %v252_v53 }
  0x33   :  { %255 = vmatpush1.bf16.msra.mxu0 %v254_v58 }
  0x34   :  { %257 = vmatprep.subr.bf16.mxu0 %v256_v59 }
  0x37   :  { %259 = vmatpush1.bf16.msra.mxu0 %v258_v0 }
  0x38   :  { %261 = vmatprep.subr.bf16.mxu0 %v260_v1 }
  0x3b   :  { %263 = vmatpush1.bf16.msra.mxu0 %v262_v6 }
  0x3c   :  { %265 = vmatprep.subr.bf16.mxu0 %v264_v7 }
  0x3f   :  { %267 = vmatpush1.bf16.msra.mxu0 %v266_v12 }
  0x40   :  { %269 = vmatprep.subr.bf16.mxu0 %v268_v13 }
  0x43   :  { %271 = vmatpush1.bf16.msra.mxu0 %v270_v18 }
  0x44   :  { %273 = vmatprep.subr.bf16.mxu0 %v272_v19 }
  0x47   :  { %275 = vmatpush1.bf16.msra.mxu0 %v274_v22 }
  0x93   :  { %v43_v25 = vpop.permute.xlu1 %42  ;;  %v31_v26 = vpop.permute.xlu0 %30 }
  0x94   :  { %vm32_vm0 = vcmp.eq.s32.totalorder %v31_v26, %v27_v24  ;;  %vm33_vm1 = vcmp.eq.s32.totalorder %v31_v26, %v28_v27  ;;  %vm44_vm6 = vcmp.eq.s32.totalorder %v43_v25, %v27_v24  ;;  %vm45_vm7 = vcmp.eq.s32.totalorder %v43_v25, %v28_v27 }
  0x98   :  { %v50_v28 = vpop.permute.xlu1 %49  ;;  %v36_v29 = vpop.permute.xlu0 %35 }
  0x99   :  { %vm37_vm2 = vcmp.eq.s32.totalorder %v36_v29, %v27_v24  ;;  %vm38_vm3 = vcmp.eq.s32.totalorder %v36_v29, %v28_v27  ;;  %vm51_vm10 = vcmp.eq.s32.totalorder %v50_v28, %v27_v24  ;;  %vm52_vm12 = vcmp.eq.s32.totalorder %v50_v28, %v28_v27 }
  0x9a   :  { %vm39_vm4 = vmor %vm32_vm0, %vm37_vm2 }
  0x9b   :  { %vm40_vm5 = vmor %vm33_vm1, %vm38_vm3 }
  0x9c   :  { %vm46_vm8 = vmor %vm39_vm4, %vm44_vm6 }
  0x9d   :  { %v57_v30 = vpop.permute.xlu1 %56  ;;  %vm47_vm9 = vmor %vm40_vm5, %vm45_vm7  ;;  %v64_v31 = vpop.permute.xlu0 %63 }
  0x9e   :  { %vm58_vm11 = vcmp.eq.s32.totalorder %v57_v30, %v27_v24  ;;  %vm59_vm13 = vcmp.eq.s32.totalorder %v57_v30, %v28_v27  ;;  %vm53_vm14 = vmor %vm46_vm8, %vm51_vm10  ;;  %vm65_vm2 = vcmp.eq.s32.totalorder %v64_v31, %v27_v24  ;;  %vm66_vm3 = vcmp.eq.s32.totalorder %v64_v31, %v28_v27 }
  0x9f   :  { %vm54_vm15 = vmor %vm47_vm9, %vm52_vm12 }
  0xa0   :  { %vm60_vm0 = vmor %vm53_vm14, %vm58_vm11  ;;  %vm139_vm14 = vcmask 654336  }
  0xa1   :  { %vm61_vm1 = vmor %vm54_vm15, %vm59_vm13 }
  0xa2   :  { %v71_v32 = vpop.permute.xlu1 %70  ;;  %vm67_vm6 = vmor %vm60_vm0, %vm65_vm2 }
  0xa3   :  { %vm72_vm4 = vcmp.eq.s32.totalorder %v71_v32, %v27_v24  ;;  %vm73_vm5 = vcmp.eq.s32.totalorder %v71_v32, %v28_v27  ;;  %vm68_vm7 = vmor %vm61_vm1, %vm66_vm3 }
  0xa4   :  { %vm74_vm8 = vmor %vm67_vm6, %vm72_vm4 }
  0xa5   :  { %vm75_vm12 = vmor %vm68_vm7, %vm73_vm5 }
  0xa7   :  { %v78_v33 = vpop.permute.xlu1 %77 }
  0xa8   :  { %vm79_vm10 = vcmp.eq.s32.totalorder %v78_v33, %v27_v24  ;;  %vm80_vm9 = vcmp.eq.s32.totalorder %v78_v33, %v28_v27 }
  0xa9   :  { %vm81_vm11 = vmor %vm74_vm8, %vm79_vm10 }
  0xaa   :  { %vm82_vm13 = vmor %vm75_vm12, %vm80_vm9  ;;  %v221_v35 = vsel %vm81_vm11, 1.0, %v332_v34 }
  0xab   :  { %v222_v36 = vsel %vm82_vm13, 1.0, %v332_v34 }
  0xac   :  { %223 = vmatprep.mubr.msk.f32.mxu0 %vm139_vm14, %v222_v36 }
  0xad   :  { %208 = vmatmul.mubr.f32.vlgmr.msra.gmra.mrb[0].mxu0 %v221_v35 }
 0x180   :  { %v209_v37 = vpop.f32.mrb[0].mxu0 }
 0x181   :  { %214 = vst [vmem:[%s381_s2] sm:$0xff] %v209_v37  ;;  %v211_v38 = vpop.f32.mrb[1].mxu0 }
 0x182   :  { %215 = vst [vmem:[%s381_s2 + $0x8] sm:$0xff] %v211_v38 }
 0x183   :  { %220 = vsyncpa [#allocation3], 1 }

</bundles_post_ra>
